<compile_context>
chip_gen: v6e
topology: v6e:2x2x1
jax: 0.10.0
libtpu: 0.0.40
codegen_flags: <defaults>
</compile_context>

<pallas_src>
import jax
import jax.numpy as jnp
from jax.experimental import pallas as pl
from jax.experimental.pallas import tpu as pltpu
import numpy as np

MXU_DTYPE = jnp.float32   # flip to jnp.bfloat16 on v6e/v7x at scaled shapes


def encoder_kernel(xp_ref, h0_ref, wih_ref, bgi_ref, whh_ref, bhn_ref, out_ref):
    TB, _ = xp_ref.shape            # (T*B, 2E) packed [x_t | x_{T-1-t}]
    B, H2 = h0_ref.shape            # H2 = 2H
    T = TB // B
    H4 = 2 * H2                     # 4H

    # ---- Hoisted input projection: ALL timesteps, BOTH directions, one matmul.
    # Columns are already interleaved [rf, rb, zf, zb, nf, nb]; b_ih (both dirs)
    # and b_hh's r/z parts are pre-folded, so nothing needs reshuffling per step.
    gi = (jnp.dot(xp_ref[...], wih_ref[...], preferred_element_type=jnp.float32)
          + bgi_ref[...])                                           # (T*B, 6H) f32

    w_hh = whh_ref[...]             # (2H, 6H) block-diag, cols [rf,rb,zf,zb,nf,nb]
    b_hn = bhn_ref[...]             # (1, 2H)  = [b_hn_f | b_hn_b]
    h = h0_ref[...]                 # (B, 2H)  = [h_f | h_b]

    # ---- Fused bidirectional recurrence (fully unrolled; T is small & static).
    # Per-step critical path: one MXU dot + sigmoid/tanh (EUP) + 3 VPU ops.
    for t in range(T):
        gi_t = gi[t * B:(t + 1) * B, :]                             # (B, 6H) static slice
        gh = jnp.dot(h.astype(w_hh.dtype), w_hh,
                     preferred_element_type=jnp.float32)            # (B, 6H)
        rz = jax.nn.sigmoid(gi_t[:, :H4] + gh[:, :H4])              # (B, 4H)
        r = rz[:, :H2]                                              # [r_f | r_b]
        z = rz[:, H2:]                                              # [z_f | z_b]
        n = jnp.tanh(gi_t[:, H4:] + r * (gh[:, H4:] + b_hn))        # (B, 2H)
        h = (1.0 - z) * n + z * h

    out_ref[...] = h.astype(out_ref.dtype)       # single lane-dense (B, 2H) store


def _prep_fused_params(p, E, H, mxu_dtype):
    """One-time prep: transpose / block-diagonalize nn.GRU params into the fused
    interleaved column layout [rf, rb, zf, zb, nf, nb]."""
    zE = jnp.zeros((E, H), jnp.float32)
    zH = jnp.zeros((H, H), jnp.float32)

    # Input weights, block-diag (2E, 6H): rows 0:E hit x_t (fwd), rows E:2E hit
    # x_{T-1-t} (bwd).  wf/wb column blocks are [W_ir^T, W_iz^T, W_in^T].
    wf, wb = p["w_ih_f"].T, p["w_ih_b"].T                           # (E, 3H) each
    w_ih_bd = jnp.concatenate([
        jnp.concatenate([wf[:, 0:H], zE, wf[:, H:2 * H], zE, wf[:, 2 * H:], zE], axis=1),
        jnp.concatenate([zE, wb[:, 0:H], zE, wb[:, H:2 * H], zE, wb[:, 2 * H:]], axis=1),
    ], axis=0)

    # Folded bias for the hoisted projection (same interleaved column layout).
    b_gi = jnp.concatenate([
        p["b_ih_f"][0:H] + p["b_hh_f"][0:H],
        p["b_ih_b"][0:H] + p["b_hh_b"][0:H],
        p["b_ih_f"][H:2 * H] + p["b_hh_f"][H:2 * H],
        p["b_ih_b"][H:2 * H] + p["b_hh_b"][H:2 * H],
        p["b_ih_f"][2 * H:],
        p["b_ih_b"][2 * H:],
    ])[None, :]                                                     # (1, 6H)

    # Hidden weights, block-diag (2H, 6H): rows [h_f | h_b], same column layout.
    hf, hb = p["w_hh_f"].T, p["w_hh_b"].T                           # (H, 3H) each
    w_hh_bd = jnp.concatenate([
        jnp.concatenate([hf[:, 0:H], zH, hf[:, H:2 * H], zH, hf[:, 2 * H:], zH], axis=1),
        jnp.concatenate([zH, hb[:, 0:H], zH, hb[:, H:2 * H], zH, hb[:, 2 * H:]], axis=1),
    ], axis=0)

    # b_hh's n part stays inside the loop (needed under r * (...)).
    b_hn = jnp.concatenate([p["b_hh_f"][2 * H:], p["b_hh_b"][2 * H:]])[None, :]

    return (w_ih_bd.astype(mxu_dtype), b_gi.astype(jnp.float32),
            w_hh_bd.astype(mxu_dtype), b_hn.astype(jnp.float32))


def make_encoder(params, emb_size, hidden_size, mxu_dtype=MXU_DTYPE):
    """Returns a jitted forward(x, h0).  Fused params are built ONCE here."""
    w_ih_bd, b_gi, w_hh_bd, b_hn = _prep_fused_params(params, emb_size, hidden_size, mxu_dtype)
    H = hidden_size
    vmem = pl.BlockSpec(memory_space=pltpu.MemorySpace.VMEM)

    @jax.jit
    def forward(x, h0):
        """x: (B, T, E) f32, h0: (2, B, H) f32 -> (1, B, 2H) f32."""
        B, T, E = x.shape
        # Free layout plumbing in the jitted wrapper (NOT inside the kernel):
        # pack [x_t | x_{T-1-t}] so one matmul emits both directions' gates in
        # the final interleaved layout, pre-flattened to 2D.
        x_f = jnp.transpose(x, (1, 0, 2))                           # (T, B, E)
        x_pack = jnp.concatenate([x_f, x_f[::-1]], axis=-1)         # (T, B, 2E)
        x_pack = x_pack.reshape(T * B, 2 * E).astype(w_ih_bd.dtype)
        h0_cat = jnp.concatenate([h0[0], h0[1]], axis=-1)           # (B, 2H)

        out = pl.pallas_call(
            encoder_kernel,
            out_shape=jax.ShapeDtypeStruct((B, 2 * H), jnp.float32),
            in_specs=[vmem] * 6,
            out_specs=vmem,
        )(x_pack, h0_cat, w_ih_bd, b_gi, w_hh_bd, b_hn)
        return out[None, :, :]                                      # (1, B, 2H)

    return forward


def encoder_reference(x, h0, p):
    """Independent pure-JAX reference using the standard PyTorch GRU formulation."""
    B, T, E = x.shape
    H = h0.shape[-1]

    def cell(x_t, h, w_ih, w_hh, b_ih, b_hh):
        gi = x_t @ w_ih.T + b_ih
        gh = h @ w_hh.T + b_hh
        r = jax.nn.sigmoid(gi[:, :H] + gh[:, :H])
        z = jax.nn.sigmoid(gi[:, H:2 * H] + gh[:, H:2 * H])
        n = jnp.tanh(gi[:, 2 * H:] + r * gh[:, 2 * H:])
        return (1.0 - z) * n + z * h

    h_f, h_b = h0[0], h0[1]
    for t in range(T):
        h_f = cell(x[:, t], h_f, p["w_ih_f"], p["w_hh_f"], p["b_ih_f"], p["b_hh_f"])
        h_b = cell(x[:, T - 1 - t], h_b, p["w_ih_b"], p["w_hh_b"], p["b_ih_b"], p["b_hh_b"])
    return jnp.concatenate([h_f, h_b], axis=-1)[None, :, :]


def init_params(key, emb_size, hidden_size):
    """Deterministic init matching nn.GRU parameter shapes (uniform +/- 1/sqrt(H))."""
    k = 1.0 / np.sqrt(hidden_size)
    keys = jax.random.split(key, 8)
    u = lambda kk, shape: jax.random.uniform(kk, shape, jnp.float32, -k, k)
    return {
        "w_ih_f": u(keys[0], (3 * hidden_size, emb_size)),
        "w_hh_f": u(keys[1], (3 * hidden_size, hidden_size)),
        "b_ih_f": u(keys[2], (3 * hidden_size,)),
        "b_hh_f": u(keys[3], (3 * hidden_size,)),
        "w_ih_b": u(keys[4], (3 * hidden_size, emb_size)),
        "w_hh_b": u(keys[5], (3 * hidden_size, hidden_size)),
        "b_ih_b": u(keys[6], (3 * hidden_size,)),
        "b_hh_b": u(keys[7], (3 * hidden_size,)),
    }


if __name__ == "__main__":
    B, T, E, H = 2, 3, 32, 32        # batch, max_senten_len (len3), emb_size, enc_hidden_size

    root = jax.random.PRNGKey(0)
    k_x, k_h, k_p = jax.random.split(root, 3)

    x = jax.random.normal(k_x, (B, T, E), jnp.float32)          # (batch, seq, emb)
    h0 = jax.random.normal(k_h, (2, B, H), jnp.float32) * 0.1   # (num_dir, batch, hidden)
    params = init_params(k_p, E, H)

    encoder = make_encoder(params, E, H)                        # fused params built once
    hidden = jax.block_until_ready(encoder(x, h0))

    ref = jax.block_until_ready(encoder_reference(x, h0, params))
    assert hidden.shape == (1, B, 2 * H)
    np.testing.assert_allclose(np.asarray(hidden), np.asarray(ref), rtol=1e-4, atol=1e-4)

    print("KERNEL_OK")
</pallas_src>

<mosaic_0001>
module attributes {stable_mosaic.version = 11 : i64} {
  func.func @encoder_kernel(%arg0: memref<6x64xf32, #tpu.memory_space<vmem>>, %arg1: memref<2x64xf32, #tpu.memory_space<vmem>>, %arg2: memref<64x192xf32, #tpu.memory_space<vmem>>, %arg3: memref<1x192xf32, #tpu.memory_space<vmem>>, %arg4: memref<64x192xf32, #tpu.memory_space<vmem>>, %arg5: memref<1x64xf32, #tpu.memory_space<vmem>>, %arg6: memref<2x64xf32, #tpu.memory_space<vmem>>) attributes {dimension_semantics = [], scalar_prefetch = 0 : i64, scratch_operands = 0 : i64, tpu.core_type = #tpu.core_type<tc>} {
    %c0 = arith.constant 0 : index
    %c0_0 = arith.constant 0 : index
    %0 = vector.load %arg0[%c0, %c0_0] : memref<6x64xf32, #tpu.memory_space<vmem>>, vector<6x64xf32>
    %c0_1 = arith.constant 0 : index
    %c0_2 = arith.constant 0 : index
    %1 = vector.load %arg2[%c0_1, %c0_2] : memref<64x192xf32, #tpu.memory_space<vmem>>, vector<64x192xf32>
    %cst = arith.constant dense<0.000000e+00> : vector<6x192xf32>
    %2 = tpu.matmul %0, %1, %cst {dimension_numbers = #tpu.dot_dimension_numbers<[1], [0], [0], [1], [0, 0, 1, 1], [], []>} : vector<6x64xf32>, vector<64x192xf32>, vector<6x192xf32> -> vector<6x192xf32>
    %c0_3 = arith.constant 0 : index
    %c0_4 = arith.constant 0 : index
    %3 = vector.load %arg3[%c0_3, %c0_4] : memref<1x192xf32, #tpu.memory_space<vmem>>, vector<1x192xf32>
    %4 = vector.broadcast %3 : vector<1x192xf32> to vector<6x192xf32>
    %5 = arith.addf %2, %4 : vector<6x192xf32>
    %c0_5 = arith.constant 0 : index
    %c0_6 = arith.constant 0 : index
    %6 = vector.load %arg4[%c0_5, %c0_6] : memref<64x192xf32, #tpu.memory_space<vmem>>, vector<64x192xf32>
    %c0_7 = arith.constant 0 : index
    %c0_8 = arith.constant 0 : index
    %7 = vector.load %arg5[%c0_7, %c0_8] : memref<1x64xf32, #tpu.memory_space<vmem>>, vector<1x64xf32>
    %c0_9 = arith.constant 0 : index
    %c0_10 = arith.constant 0 : index
    %8 = vector.load %arg1[%c0_9, %c0_10] : memref<2x64xf32, #tpu.memory_space<vmem>>, vector<2x64xf32>
    %9 = vector.extract_strided_slice %5 {offsets = [0, 0], sizes = [2, 192], strides = [1, 1]} : vector<6x192xf32> to vector<2x192xf32>
    %cst_11 = arith.constant dense<0.000000e+00> : vector<2x192xf32>
    %10 = tpu.matmul %8, %6, %cst_11 {dimension_numbers = #tpu.dot_dimension_numbers<[1], [0], [0], [1], [0, 0, 1, 1], [], []>} : vector<2x64xf32>, vector<64x192xf32>, vector<2x192xf32> -> vector<2x192xf32>
    %11 = vector.extract_strided_slice %9 {offsets = [0, 0], sizes = [2, 128], strides = [1, 1]} : vector<2x192xf32> to vector<2x128xf32>
    %12 = vector.extract_strided_slice %10 {offsets = [0, 0], sizes = [2, 128], strides = [1, 1]} : vector<2x192xf32> to vector<2x128xf32>
    %13 = arith.addf %11, %12 : vector<2x128xf32>
    %14 = arith.negf %13 : vector<2x128xf32>
    %15 = math.exp %14 : vector<2x128xf32>
    %cst_12 = arith.constant 1.000000e+00 : f32
    %16 = vector.broadcast %cst_12 : f32 to vector<2x128xf32>
    %17 = arith.addf %16, %15 : vector<2x128xf32>
    %18 = arith.divf %16, %17 : vector<2x128xf32>
    %19 = vector.extract_strided_slice %18 {offsets = [0, 0], sizes = [2, 64], strides = [1, 1]} : vector<2x128xf32> to vector<2x64xf32>
    %20 = vector.extract_strided_slice %18 {offsets = [0, 64], sizes = [2, 64], strides = [1, 1]} : vector<2x128xf32> to vector<2x64xf32>
    %21 = vector.extract_strided_slice %9 {offsets = [0, 128], sizes = [2, 64], strides = [1, 1]} : vector<2x192xf32> to vector<2x64xf32>
    %22 = vector.extract_strided_slice %10 {offsets = [0, 128], sizes = [2, 64], strides = [1, 1]} : vector<2x192xf32> to vector<2x64xf32>
    %23 = vector.broadcast %7 : vector<1x64xf32> to vector<2x64xf32>
    %24 = arith.addf %22, %23 : vector<2x64xf32>
    %25 = arith.mulf %19, %24 : vector<2x64xf32>
    %26 = arith.addf %21, %25 : vector<2x64xf32>
    %27 = math.tanh %26 : vector<2x64xf32>
    %cst_13 = arith.constant 1.000000e+00 : f32
    %28 = vector.broadcast %cst_13 : f32 to vector<2x64xf32>
    %29 = arith.subf %28, %20 : vector<2x64xf32>
    %30 = arith.mulf %29, %27 : vector<2x64xf32>
    %31 = arith.mulf %20, %8 : vector<2x64xf32>
    %32 = arith.addf %30, %31 : vector<2x64xf32>
    %33 = vector.extract_strided_slice %5 {offsets = [2, 0], sizes = [2, 192], strides = [1, 1]} : vector<6x192xf32> to vector<2x192xf32>
    %cst_14 = arith.constant dense<0.000000e+00> : vector<2x192xf32>
    %34 = tpu.matmul %32, %6, %cst_14 {dimension_numbers = #tpu.dot_dimension_numbers<[1], [0], [0], [1], [0, 0, 1, 1], [], []>} : vector<2x64xf32>, vector<64x192xf32>, vector<2x192xf32> -> vector<2x192xf32>
    %35 = vector.extract_strided_slice %33 {offsets = [0, 0], sizes = [2, 128], strides = [1, 1]} : vector<2x192xf32> to vector<2x128xf32>
    %36 = vector.extract_strided_slice %34 {offsets = [0, 0], sizes = [2, 128], strides = [1, 1]} : vector<2x192xf32> to vector<2x128xf32>
    %37 = arith.addf %35, %36 : vector<2x128xf32>
    %38 = arith.negf %37 : vector<2x128xf32>
    %39 = math.exp %38 : vector<2x128xf32>
    %cst_15 = arith.constant 1.000000e+00 : f32
    %40 = vector.broadcast %cst_15 : f32 to vector<2x128xf32>
    %41 = arith.addf %40, %39 : vector<2x128xf32>
    %42 = arith.divf %40, %41 : vector<2x128xf32>
    %43 = vector.extract_strided_slice %42 {offsets = [0, 0], sizes = [2, 64], strides = [1, 1]} : vector<2x128xf32> to vector<2x64xf32>
    %44 = vector.extract_strided_slice %42 {offsets = [0, 64], sizes = [2, 64], strides = [1, 1]} : vector<2x128xf32> to vector<2x64xf32>
    %45 = vector.extract_strided_slice %33 {offsets = [0, 128], sizes = [2, 64], strides = [1, 1]} : vector<2x192xf32> to vector<2x64xf32>
    %46 = vector.extract_strided_slice %34 {offsets = [0, 128], sizes = [2, 64], strides = [1, 1]} : vector<2x192xf32> to vector<2x64xf32>
    %47 = vector.broadcast %7 : vector<1x64xf32> to vector<2x64xf32>
    %48 = arith.addf %46, %47 : vector<2x64xf32>
    %49 = arith.mulf %43, %48 : vector<2x64xf32>
    %50 = arith.addf %45, %49 : vector<2x64xf32>
    %51 = math.tanh %50 : vector<2x64xf32>
    %cst_16 = arith.constant 1.000000e+00 : f32
    %52 = vector.broadcast %cst_16 : f32 to vector<2x64xf32>
    %53 = arith.subf %52, %44 : vector<2x64xf32>
    %54 = arith.mulf %53, %51 : vector<2x64xf32>
    %55 = arith.mulf %44, %32 : vector<2x64xf32>
    %56 = arith.addf %54, %55 : vector<2x64xf32>
    %57 = vector.extract_strided_slice %5 {offsets = [4, 0], sizes = [2, 192], strides = [1, 1]} : vector<6x192xf32> to vector<2x192xf32>
    %cst_17 = arith.constant dense<0.000000e+00> : vector<2x192xf32>
    %58 = tpu.matmul %56, %6, %cst_17 {dimension_numbers = #tpu.dot_dimension_numbers<[1], [0], [0], [1], [0, 0, 1, 1], [], []>} : vector<2x64xf32>, vector<64x192xf32>, vector<2x192xf32> -> vector<2x192xf32>
    %59 = vector.extract_strided_slice %57 {offsets = [0, 0], sizes = [2, 128], strides = [1, 1]} : vector<2x192xf32> to vector<2x128xf32>
    %60 = vector.extract_strided_slice %58 {offsets = [0, 0], sizes = [2, 128], strides = [1, 1]} : vector<2x192xf32> to vector<2x128xf32>
    %61 = arith.addf %59, %60 : vector<2x128xf32>
    %62 = arith.negf %61 : vector<2x128xf32>
    %63 = math.exp %62 : vector<2x128xf32>
    %cst_18 = arith.constant 1.000000e+00 : f32
    %64 = vector.broadcast %cst_18 : f32 to vector<2x128xf32>
    %65 = arith.addf %64, %63 : vector<2x128xf32>
    %66 = arith.divf %64, %65 : vector<2x128xf32>
    %67 = vector.extract_strided_slice %66 {offsets = [0, 0], sizes = [2, 64], strides = [1, 1]} : vector<2x128xf32> to vector<2x64xf32>
    %68 = vector.extract_strided_slice %66 {offsets = [0, 64], sizes = [2, 64], strides = [1, 1]} : vector<2x128xf32> to vector<2x64xf32>
    %69 = vector.extract_strided_slice %57 {offsets = [0, 128], sizes = [2, 64], strides = [1, 1]} : vector<2x192xf32> to vector<2x64xf32>
    %70 = vector.extract_strided_slice %58 {offsets = [0, 128], sizes = [2, 64], strides = [1, 1]} : vector<2x192xf32> to vector<2x64xf32>
    %71 = vector.broadcast %7 : vector<1x64xf32> to vector<2x64xf32>
    %72 = arith.addf %70, %71 : vector<2x64xf32>
    %73 = arith.mulf %67, %72 : vector<2x64xf32>
    %74 = arith.addf %69, %73 : vector<2x64xf32>
    %75 = math.tanh %74 : vector<2x64xf32>
    %cst_19 = arith.constant 1.000000e+00 : f32
    %76 = vector.broadcast %cst_19 : f32 to vector<2x64xf32>
    %77 = arith.subf %76, %68 : vector<2x64xf32>
    %78 = arith.mulf %77, %75 : vector<2x64xf32>
    %79 = arith.mulf %68, %56 : vector<2x64xf32>
    %80 = arith.addf %78, %79 : vector<2x64xf32>
    %c0_20 = arith.constant 0 : index
    %c0_21 = arith.constant 0 : index
    %81 = vector.load %arg6[%c0_20, %c0_21] : memref<2x64xf32, #tpu.memory_space<vmem>>, vector<2x64xf32>
    tpu.vector_store %arg6[%c0_20, %c0_21], %80 {strides = array<i32>} : memref<2x64xf32, #tpu.memory_space<vmem>>, vector<2x64xf32>,
    return
  }
}

</mosaic_0001>

<bundles_post_ra>
// kernel: forward.1
= control target key start
LH: loop header
LB: loop body
LE: loop exit
PB: predicated region body
PF: predicated region fallthrough
CT: control target
= control target key end

     0   :  { %11 = vsyncpa [#allocation3], 0  ;;  %s716_s0 = inlined_call_operand.vmem [shape: f32[6,64], index: 0, kind: input, shape index: {}]   ;;  %s717_s1 = inlined_call_operand.vmem [shape: f32[2,64], index: 1, kind: input, shape index: {}]   ;;  %s718_s2 = inlined_call_operand.hbm [shape: f32[64,192], index: 2, kind: input, shape index: {}]   ;;  %s719_s3 = inlined_call_operand.vmem [shape: f32[1,192], index: 3, kind: input, shape index: {}]   ;;  %s720_s4 = inlined_call_operand.hbm [shape: f32[64,192], index: 4, kind: input, shape index: {}]   ;;  %s721_s5 = inlined_call_operand.vmem [shape: f32[1,64], index: 5, kind: input, shape index: {}]   ;;  %s722_s6 = inlined_call_operand.hbm [shape: f32[2,64], index: 6, kind: output, shape index: {}]  }
   0x1   :  { %12 = vsyncpa [#allocation6], 0 }
   0x2   :  { %13 = vsyncpa [#allocation4], 0  ;;  %s604_s21 = smov [#allocation2]  }
   0x3   :  { %s23_s22 = sshll.u32 %s604_s21, 4  ;;  %s24_s22 = int_to_ptr.vmem [resolvable:$true] %s23_s22 }
   0x4   :  { %s546_s23 = scalar_lea.vmem %s24_s22, 2048  ;;  %p551_p1 = scmp.lt.s32.totalorder %s24_s22, %s24_s22 }
   0x5   :  { %p547_p0 = scmp.ne.s32.totalorder %s24_s22, %s546_s23  ;;  %p552_p2 = scmp.lt.s32.totalorder %s546_s23, %s546_s23 }
   0x7   :  { %p553_p3 = por %p552_p2, %p551_p1 }
   0x9   :  { %p554_p4 = pnand %p553_p3, %p547_p0 }
   0xb   :  { %557 = shalt.err (!%p554_p4)
}
   0xc   :  { %s605_s24 = smov 256   ;;  %s606_s25 = smov 16  }
   0xd   :  { %29 = dma.hbm_to_vmem [thread:$0]  %s718_s2, 2048, %s24_s22, [#allocation3], %s605_s24, %s605_s24, %s606_s25  }
   0xe   :  { %s607_s28 = smov [#allocation5]  }
   0xf   :  { %s37_s29 = sshll.u32 %s607_s28, 4  ;;  %s38_s29 = int_to_ptr.vmem [resolvable:$true] %s37_s29 }
  0x10   :  { %s566_s30 = scalar_lea.vmem %s38_s29, 2048  ;;  %p571_p6 = scmp.lt.s32.totalorder %s38_s29, %s38_s29 }
  0x11   :  { %p567_p5 = scmp.ne.s32.totalorder %s38_s29, %s566_s30  ;;  %p572_p7 = scmp.lt.s32.totalorder %s566_s30, %s566_s30 }
  0x13   :  { %p573_p8 = por %p572_p7, %p571_p6 }
  0x15   :  { %p574_p9 = pnand %p573_p8, %p567_p5 }
  0x17   :  { %577 = shalt.err (!%p574_p9)
}
  0x18   :  { %43 = dma.hbm_to_vmem [thread:$0]  %s720_s4, 2048, %s38_s29, [#allocation6], %s605_s24, %s605_s24, %s606_s25  }
  0x19   :  { %598 = dma.done.wait [#allocation3], 2048  }
  0x1a   :  { %599 = vsyncadd [#allocation3], 4294965248 }
  0x1b   :  { %600 = dma.done.wait [#allocation6], 2048  }
  0x1c   :  { %601 = vsyncadd [#allocation6], 4294965248  ;;  %v608_v0 = vmov 0.0   ;;  %v68_v1 = vld [vmem:[#allocation2 + $0x78] sm:$0xff]  ;;  %v67_v3 = vld [vmem:[#allocation2 + $0x70] sm:$0xff]  ;;  %vm81_vm0 = vcmask 523264   ;;  %v71_v35 = vlaneseq }
  0x1d   :  { %149 = vmatprep.mubr.f32.mxu0 %v608_v0  ;;  %241 = vmatprep.mubr.f32.mxu1 %v608_v0  ;;  %v654_v2 = vld [vmem:[#allocation5 + $0x78] sm:$0xff]  ;;  %v657_v4 = vld [vmem:[#allocation5 + $0x70] sm:$0xff]  ;;  %v66_v5 = vld [vmem:[#allocation2 + $0x68] sm:$0xff]  ;;  %vm487_vm1 = vcmask 521220  }
  0x1e   :  { %101 = vmatprep.subr.mxu0 %v68_v1  ;;  %193 = vmatprep.subr.mxu1 %v654_v2  ;;  %v659_v6 = vld [vmem:[#allocation5 + $0x68] sm:$0xff]  ;;  %v65_v7 = vld [vmem:[#allocation2 + $0x60] sm:$0xff]  ;;  %v64_v9 = vld [vmem:[#allocation2 + $0x58] sm:$0xff]  ;;  %v72_v36 = vshrl.u32 %v71_v35, 7 }
  0x1f   :  { %102 = vmatpush1.msra.mxu0 %v67_v3  ;;  %194 = vmatpush1.msra.mxu1 %v657_v4  ;;  %v662_v8 = vld [vmem:[#allocation5 + $0x60] sm:$0xff]  ;;  %v665_v10 = vld [vmem:[#allocation5 + $0x58] sm:$0xff]  ;;  %v63_v11 = vld [vmem:[#allocation2 + $0x50] sm:$0xff] }
  0x20   :  { %103 = vmatprep.subr.mxu0 %v66_v5  ;;  %195 = vmatprep.subr.mxu1 %v659_v6  ;;  %v667_v12 = vld [vmem:[#allocation5 + $0x50] sm:$0xff]  ;;  %v62_v13 = vld [vmem:[#allocation2 + $0x48] sm:$0xff]  ;;  %v61_v15 = vld [vmem:[#allocation2 + $0x40] sm:$0xff]  ;;  %v73_v37 = vsub.s32 0, %v72_v36  ;;  %v77_v47 = vsub.s32 1, %v72_v36 }
  0x21   :  { %104 = vmatpush1.msra.mxu0 %v65_v7  ;;  %196 = vmatpush1.msra.mxu1 %v662_v8  ;;  %v165_v14 = vld [vmem:[#allocation5 + $0x48] sm:$0xff]  ;;  %v164_v16 = vld [vmem:[#allocation5 + $0x40] sm:$0xff]  ;;  %v60_v17 = vld [vmem:[#allocation2 + $0x38] sm:$0xff] }
  0x22   :  { %105 = vmatprep.subr.mxu0 %v64_v9  ;;  %197 = vmatprep.subr.mxu1 %v665_v10  ;;  %v163_v18 = vld [vmem:[#allocation5 + $0x38] sm:$0xff]  ;;  %v59_v19 = vld [vmem:[#allocation2 + $0x30] sm:$0xff]  ;;  %v58_v21 = vld [vmem:[#allocation2 + $0x28] sm:$0xff] }
  0x23   :  { %106 = vmatpush1.msra.mxu0 %v63_v11  ;;  %198 = vmatpush1.msra.mxu1 %v667_v12  ;;  %v162_v20 = vld [vmem:[#allocation5 + $0x30] sm:$0xff]  ;;  %v161_v22 = vld [vmem:[#allocation5 + $0x28] sm:$0xff]  ;;  %v57_v23 = vld [vmem:[#allocation2 + $0x20] sm:$0xff] }
  0x24   :  { %107 = vmatprep.subr.mxu0 %v62_v13  ;;  %199 = vmatprep.subr.mxu1 %v165_v14  ;;  %v160_v24 = vld [vmem:[#allocation5 + $0x20] sm:$0xff]  ;;  %v56_v25 = vld [vmem:[#allocation2 + $0x18] sm:$0xff]  ;;  %v55_v27 = vld [vmem:[#allocation2 + $0x10] sm:$0xff] }
  0x25   :  { %108 = vmatpush1.msra.mxu0 %v61_v15  ;;  %200 = vmatpush1.msra.mxu1 %v164_v16  ;;  %v159_v26 = vld [vmem:[#allocation5 + $0x18] sm:$0xff]  ;;  %v158_v28 = vld [vmem:[#allocation5 + $0x10] sm:$0xff]  ;;  %v54_v29 = vld [vmem:[#allocation2 + $0x8] sm:$0xff] }
  0x26   :  { %109 = vmatprep.subr.mxu0 %v60_v17  ;;  %201 = vmatprep.subr.mxu1 %v163_v18  ;;  %v157_v30 = vld [vmem:[#allocation5 + $0x8] sm:$0xff]  ;;  %v53_v31 = vld [vmem:[#allocation2] sm:$0xff] }
  0x27   :  { %110 = vmatpush1.msra.mxu0 %v59_v19  ;;  %202 = vmatpush1.msra.mxu1 %v162_v20  ;;  %v156_v32 = vld [vmem:[#allocation5] sm:$0xff] }
  0x28   :  { %111 = vmatprep.subr.mxu0 %v58_v21  ;;  %203 = vmatprep.subr.mxu1 %v161_v22  ;;  %v52_v33 = vld [vmem:[%s716_s0] sm:$0x3f] }
  0x29   :  { %112 = vmatpush1.msra.mxu0 %v57_v23  ;;  %204 = vmatpush1.msra.mxu1 %v160_v24  ;;  %v678_v34 = vld [vmem:[%s717_s1] sm:$0x3] }
  0x2a   :  { %113 = vmatprep.subr.mxu0 %v56_v25  ;;  %205 = vmatprep.subr.mxu1 %v159_v26  ;;  %v69_v38 = vld [vmem:[%s719_s3] sm:$0x3]  ;;  %s609_s3 = smov 64  }
  0x2b   :  { %114 = vmatpush1.msra.mxu0 %v55_v27  ;;  %206 = vmatpush1.msra.mxu1 %v158_v28  ;;  %v74_v39 = vrot.slane %v69_v38, %v73_v37  ;;  %v508_v48 = vld [vmem:[%s721_s5] ss:$0 sm:$0xff]  ;;  %v78_v50 = vrot.slane %v69_v38, %v77_v47  ;;  %s610_s5 = smov [#allocation7]  }
  0x2c   :  { %115 = vmatprep.subr.mxu0 %v54_v29  ;;  %207 = vmatprep.subr.mxu1 %v157_v30  ;;  %s495_s13 = sshll.u32 %s610_s5, 4  ;;  %s496_s13 = int_to_ptr.vmem [resolvable:$true] %s495_s13 }
  0x2d   :  { %116 = vmatpush1.msra.mxu0 %v53_v31  ;;  %208 = vmatpush1.msra.mxu1 %v156_v32  ;;  %s578_s14 = scalar_lea.vmem %s496_s13, 32  ;;  %p583_p11 = scmp.lt.s32.totalorder %s496_s13, %s496_s13 }
  0x2e   :  { %505 = vmatmul.mubr.msk.f32.vlgmr.msra.gmra.mxu0 %vm81_vm0, %v52_v33  ;;  %506 = vmatmul.mubr.msk.f32.vlgmr.msra.gmra.mxu1 %vm81_vm0, %v678_v34  ;;  %p579_p10 = scmp.ne.s32.totalorder %s496_s13, %s578_s14  ;;  %p584_p12 = scmp.lt.s32.totalorder %s578_s14, %s578_s14 }
  0x2f   :  { %297 = vmatprep.subr.mxu0 %v654_v2  ;;  %345 = vmatprep.mubr.f32.mxu0 %v608_v0 }
  0x30   :  { %298 = vmatpush1.msra.mxu0 %v657_v4  ;;  %401 = vmatprep.subr.mxu1 %v654_v2  ;;  %p585_p13 = por %p584_p12, %p583_p11 }
  0x31   :  { %299 = vmatprep.subr.mxu0 %v659_v6  ;;  %402 = vmatpush1.msra.mxu1 %v657_v4 }
  0x32   :  { %300 = vmatpush1.msra.mxu0 %v662_v8  ;;  %403 = vmatprep.subr.mxu1 %v659_v6  ;;  %p586_p0 = pnand %p585_p13, %p579_p10 }
  0x33   :  { %301 = vmatprep.subr.mxu0 %v665_v10  ;;  %404 = vmatpush1.msra.mxu1 %v662_v8 }
  0x34   :  { %302 = vmatpush1.msra.mxu0 %v667_v12  ;;  %405 = vmatprep.subr.mxu1 %v665_v10 }
  0x35   :  { %303 = vmatprep.subr.mxu0 %v165_v14  ;;  %406 = vmatpush1.msra.mxu1 %v667_v12 }
  0x36   :  { %304 = vmatpush1.msra.mxu0 %v164_v16  ;;  %407 = vmatprep.subr.mxu1 %v165_v14 }
  0x37   :  { %305 = vmatprep.subr.mxu0 %v163_v18  ;;  %408 = vmatpush1.msra.mxu1 %v164_v16 }
  0x38   :  { %306 = vmatpush1.msra.mxu0 %v162_v20  ;;  %409 = vmatprep.subr.mxu1 %v163_v18 }
  0x39   :  { %307 = vmatprep.subr.mxu0 %v161_v22  ;;  %410 = vmatpush1.msra.mxu1 %v162_v20 }
  0x3a   :  { %308 = vmatpush1.msra.mxu0 %v160_v24  ;;  %411 = vmatprep.subr.mxu1 %v161_v22 }
  0x3b   :  { %309 = vmatprep.subr.mxu0 %v159_v26  ;;  %412 = vmatpush1.msra.mxu1 %v160_v24 }
  0x3c   :  { %310 = vmatpush1.msra.mxu0 %v158_v28  ;;  %413 = vmatprep.subr.mxu1 %v159_v26 }
  0x3d   :  { %311 = vmatprep.subr.mxu0 %v157_v30  ;;  %414 = vmatpush1.msra.mxu1 %v158_v28 }
  0x3e   :  { %312 = vmatpush1.msra.mxu0 %v156_v32  ;;  %415 = vmatprep.subr.mxu1 %v157_v30 }
  0x3f   :  { %416 = vmatpush1.msra.mxu1 %v156_v32  ;;  %449 = vmatprep.mubr.f32.mxu1 %v608_v0 }
  0xee   :  { %v151_v40 = vpop.f32.mrf.mxu0  ;;  %v243_v42 = vpop.f32.mrf.mxu1 }
  0xef   :  { %v152_v41 = vadd.f32 %v151_v40, %v74_v39 }
  0xf0   :  { %v245_v49 = vpop.f32.mrf.mxu1  ;;  %v153_v51 = vpop.f32.mrf.mxu0 }
  0xf1   :  { %v248_v43 = vadd.f32 %v243_v42, %v152_v41  ;;  %v261_v52 = vadd.f32 %v508_v48, %v245_v49  ;;  %v154_v54 = vadd.f32 %v153_v51, %v78_v50 }
  0xf3   :  { %v507_v44 = vmul.f32 -1.442695, %v248_v43 }
  0xf5   :  { %520 = vpow2.f32 %v507_v44 }
 0x102   :  { %v521_v45 = vpop.eup %520 }
 0x103   :  { %v252_v46 = vadd.f32 1.0, %v521_v45 }
 0x105   :  { %522 = vrcp.f32 %v252_v46 }
 0x112   :  { %v523_v53 = vpop.eup %522 }
 0x113   :  { %v262_v55 = vmul.f32 %v523_v53, %v261_v52  ;;  %v265_v59 = vsub.f32 1.0, %v523_v53 }
 0x115   :  { %v263_v56 = vadd.f32 %v262_v55, %v154_v54 }
 0x117   :  { %524 = vtanh.f32 %v263_v56 }
 0x124   :  { %v525_v57 = vpop.eup %524 }
 0x125   :  { %267 = vrot.lane.b32.xlu0 %v525_v57, %s609_s3 }
 0x129   :  { %271 = vrot.lane.b32.xlu0 %v678_v34, %s609_s3 }
 0x197   :  { %v268_v58 = vpop.permute.xlu0 %267 }
 0x198   :  { %v270_v61 = vmul.f32 %v268_v58, %v265_v59 }
 0x19b   :  { %v272_v60 = vpop.permute.xlu0 %271 }
 0x19c   :  { %v274_v62 = vmul.f32 %v523_v53, %v272_v60 }
 0x19e   :  { %v275_v63 = vadd.f32 %v274_v62, %v270_v61 }
 0x1a0   :  { %277 = vrot.lane.b32.xlu1 %v275_v63, %s609_s3  ;;  %v375_v9 = vrot.slane %v275_v63, 6 }
 0x212   :  { %v278_v0 = vpop.permute.xlu1 %277 }
 0x213   :  { %509 = vmatmul.mubr.msk.f32.vlgmr.msra.gmra.mxu0 %vm81_vm0, %v278_v0 }
 0x2d3   :  { %v347_v1 = vpop.f32.mrf.mxu0 }
 0x2d4   :  { %v353_v2 = vrot.slane %v347_v1, 6 }
 0x2d5   :  { %v349_v7 = vpop.f32.mrf.mxu0 }
 0x2d6   :  { %v355_v3 = vadd.f32 %v353_v2, %v152_v41  ;;  %v362_v8 = vadd.f32 %v508_v48, %v349_v7 }
 0x2d8   :  { %v510_v4 = vmul.f32 -1.442695, %v355_v3  ;;  %v364_v10 = vrot.slane %v362_v8, 6 }
 0x2da   :  { %526 = vpow2.f32 %v510_v4 }
 0x2e7   :  { %v527_v5 = vpop.eup %526 }
 0x2e8   :  { %v359_v6 = vadd.f32 1.0, %v527_v5 }
 0x2ea   :  { %528 = vrcp.f32 %v359_v6 }
 0x2f7   :  { %v529_v11 = vpop.eup %528 }
 0x2f8   :  { %v366_v12 = vmul.f32 %v529_v11, %v364_v10  ;;  %v377_v13 = vmul.f32 %v529_v11, %v375_v9  ;;  %v369_v16 = vsub.f32 1.0, %v529_v11 }
 0x2fa   :  { %v367_v14 = vadd.f32 %v366_v12, %v154_v54 }
 0x2fc   :  { %530 = vtanh.f32 %v367_v14 }
 0x309   :  { %v531_v15 = vpop.eup %530 }
 0x30a   :  { %371 = vrot.lane.b32.xlu1 %v531_v15, %s609_s3 }
 0x37c   :  { %v372_v17 = vpop.permute.xlu1 %371 }
 0x37d   :  { %v374_v18 = vmul.f32 %v372_v17, %v369_v16 }
 0x37f   :  { %v378_v19 = vadd.f32 %v377_v13, %v374_v18 }
 0x381   :  { %v380_v20 = vrot.slane %v378_v19, 2  ;;  %v479_v30 = vrot.slane %v378_v19, 6 }
 0x383   :  { %381 = vrot.lane.b32.xlu0 %v380_v20, %s609_s3 }
 0x3f5   :  { %v382_v21 = vpop.permute.xlu0 %381 }
 0x3f6   :  { %511 = vmatmul.mubr.msk.f32.vlgmr.msra.gmra.mxu1 %vm81_vm0, %v382_v21 }
 0x4b6   :  { %v451_v22 = vpop.f32.mrf.mxu1 }
 0x4b7   :  { %v457_v23 = vrot.slane %v451_v22, 4 }
 0x4b8   :  { %v453_v28 = vpop.f32.mrf.mxu1 }
 0x4b9   :  { %v459_v24 = vadd.f32 %v457_v23, %v152_v41  ;;  %v466_v29 = vadd.f32 %v508_v48, %v453_v28 }
 0x4bb   :  { %v512_v25 = vmul.f32 -1.442695, %v459_v24  ;;  %v468_v31 = vrot.slane %v466_v29, 4 }
 0x4bd   :  { %532 = vpow2.f32 %v512_v25 }
 0x4ca   :  { %v533_v26 = vpop.eup %532 }
 0x4cb   :  { %v463_v27 = vadd.f32 1.0, %v533_v26 }
 0x4cd   :  { %534 = vrcp.f32 %v463_v27 }
 0x4da   :  { %v535_v32 = vpop.eup %534 }
 0x4db   :  { %v470_v33 = vmul.f32 %v535_v32, %v468_v31  ;;  %v481_v34 = vmul.f32 %v535_v32, %v479_v30  ;;  %v473_v37 = vsub.f32 1.0, %v535_v32 }
 0x4dd   :  { %v471_v35 = vadd.f32 %v470_v33, %v154_v54 }
 0x4df   :  { %536 = vtanh.f32 %v471_v35 }
 0x4ec   :  { %v537_v36 = vpop.eup %536 }
 0x4ed   :  { %475 = vrot.lane.b32.xlu1 %v537_v36, %s609_s3 }
 0x55f   :  { %v476_v38 = vpop.permute.xlu1 %475 }
 0x560   :  { %v478_v39 = vmul.f32 %v476_v38, %v473_v37 }
 0x562   :  { %v482_v40 = vadd.f32 %v481_v34, %v478_v39 }
 0x564   :  { %484 = vrot.lane.b32.xlu0 %v482_v40, %s609_s3 }
 0x5d6   :  { %v485_v41 = vpop.permute.xlu0 %484 }
 0x5d7   :  { %488 = vst.msk [vmem:[#allocation7 - $0x4] sm:$0x30] %vm487_vm1, %v485_v41 }
 0x5d8   :  { %589 = shalt.err (!%p586_p0)
}
 0x5d9   :  { %498 = dma.vmem_to_hbm [thread:$0]  %s496_s13, 32, %s722_s6, [#allocation4]  }
 0x5da   :  { %602 = dma.done.wait [#allocation4], 32  }
 0x5db   :  { %603 = vsyncadd [#allocation4], 4294967264 }
 0x5dc   :  { %502 = vsyncpa [#allocation3], 1 }
 0x5dd   :  { %503 = vsyncpa [#allocation6], 1 }
 0x5de   :  { %504 = vsyncpa [#allocation4], 1 }

</bundles_post_ra>
